<compile_context>
chip_gen: v6e
topology: v6e:2x2x1
jax: 0.10.0
libtpu: 0.0.40
codegen_flags: <defaults>
</compile_context>

<pallas_src>
import functools

import jax
import jax.numpy as jnp
from jax.experimental import pallas as pl
from jax.experimental.pallas import tpu as pltpu


def _kl_pair_kernel(g1_ref, t1_ref, g2_ref, t2_ref, o_ref, *, inv_scale):
    """Accumulate sum_{rows,d} q*(log q - log p) for BOTH KL terms; scale at the end.

    g*_ref, t*_ref : (tile_rows, D) logit tiles (generated / target) for term 1 and 2.
    o_ref          : (1, 1) f32 accumulator, resident across the whole grid.
    """
    step = pl.program_id(0)

    @pl.when(step == 0)
    def _init():
        o_ref[...] = jnp.zeros_like(o_ref)

    def kl_partial(g_ref, t_ref):
        g = g_ref[...].astype(jnp.float32)                                   # (R, D)
        t = t_ref[...].astype(jnp.float32)                                   # (R, D)
        # Numerically-stable row-wise log-softmax for both operands.
        g_shift = g - jnp.max(g, axis=-1, keepdims=True)
        t_shift = t - jnp.max(t, axis=-1, keepdims=True)
        g_lse = jnp.log(jnp.sum(jnp.exp(g_shift), axis=-1, keepdims=True))   # (R, 1)
        t_lse = jnp.log(jnp.sum(jnp.exp(t_shift), axis=-1, keepdims=True))   # (R, 1)
        log_p = g_shift - g_lse
        log_q = t_shift - t_lse
        q = jnp.exp(log_q)
        row_kl = jnp.sum(q * (log_q - log_p), axis=-1, keepdims=True)        # (R, 1)
        return jnp.sum(row_kl, axis=0, keepdims=True)                        # (1, 1)

    o_ref[...] = o_ref[...] + kl_partial(g1_ref, t1_ref) + kl_partial(g2_ref, t2_ref)

    @pl.when(step == pl.num_programs(0) - 1)
    def _finalize():
        o_ref[...] = o_ref[...] * inv_scale


def kl_loss_pair_pallas(gen1, tgt1, gen2, tgt2, *, max_tile_rows=128):
    """Returns (KL(gen1||tgt1) + KL(gen2||tgt2)) / 2 with batchmean reduction.

    gen*, tgt*: (B, D) logits. Both terms computed per grid step from 4 direct inputs
    (no wrapper-side concatenation / extra HBM copies).
    """
    B, D = gen1.shape

    # Sublane-granular, batch-adaptive row tile.
    tile_rows = min(max_tile_rows, ((B + 7) // 8) * 8)
    padded = ((B + tile_rows - 1) // tile_rows) * tile_rows

    def pad(x):
        # Zero-padded rows contribute exactly 0: identical (uniform) distributions
        # give log_q - log_p == 0 elementwise.
        if padded != B:
            x = jnp.pad(x, ((0, padded - B), (0, 0)))
        return x

    gen1, tgt1, gen2, tgt2 = pad(gen1), pad(tgt1), pad(gen2), pad(tgt2)

    grid = (padded // tile_rows,)
    kernel = functools.partial(_kl_pair_kernel, inv_scale=1.0 / (2.0 * B))

    row_spec = pl.BlockSpec((tile_rows, D), lambda i: (i, 0))

    out = pl.pallas_call(
        kernel,
        out_shape=jax.ShapeDtypeStruct((1, 1), jnp.float32),
        grid_spec=pltpu.PrefetchScalarGridSpec(
            num_scalar_prefetch=0,
            grid=grid,
            # Full-D (lane-dense) blocks: the row-wise log-softmax needs the whole
            # feature axis resident.  D = 768 is a multiple of 128.
            in_specs=[row_spec, row_spec, row_spec, row_spec],
            out_specs=pl.BlockSpec((1, 1), lambda i: (0, 0)),
        ),
        # The single grid axis is a reduction into the resident output block.
        compiler_params=pltpu.CompilerParams(dimension_semantics=("arbitrary",)),
    )(gen1, tgt1, gen2, tgt2)
    return out[0, 0]


def kl_defen_forward(x_feat, x_feat_noise, part_layer_fn, *, max_tile_rows=128):
    """KL_defen.forward. x_feat, x_feat_noise: (B, S, D); part_layer_fn: JAX callable."""
    # Token-swap construction: pure data movement, done with jnp slicing/concat.
    part_token1 = x_feat[:, 0:1]
    part_token1_noise = x_feat_noise[:, 0:1]
    new_x_feat1 = jnp.concatenate([part_token1, x_feat_noise[:, 1:]], axis=1)
    # part_token1[:, 1:] is empty (matches the PyTorch code exactly).
    new_x_feat1_noise = jnp.concatenate([part_token1_noise, part_token1[:, 1:]], axis=1)

    # TODO(synk): `part_layer` is an arbitrary injected nn.Module (e.g. a transformer
    # block) with no definition in the spec; it is accepted as a user-supplied JAX
    # callable here rather than translated to Pallas.
    a1 = part_layer_fn(new_x_feat1)[:, 0]        # (B, D)
    a2 = part_layer_fn(new_x_feat1_noise)[:, 0]  # (B, D)

    return kl_loss_pair_pallas(a1, x_feat[:, 0], a2, x_feat_noise[:, 0],
                               max_tile_rows=max_tile_rows)


if __name__ == "__main__":
    # Small deterministic shapes consistent with the module (in_planes = 768).
    B, S, D = 2, 8, 768

    key = jax.random.PRNGKey(0)
    k1, k2, k3 = jax.random.split(key, 3)
    x_feat = jax.random.normal(k1, (B, S, D), dtype=jnp.float32)
    x_feat_noise = x_feat + 0.1 * jax.random.normal(k2, (B, S, D), dtype=jnp.float32)

    # Deterministic stand-in for the injected `part_layer` (per-token linear + tanh).
    W = 0.05 * jax.random.normal(k3, (D, D), dtype=jnp.float32)
    part_layer = lambda x: jnp.tanh(x @ W)

    loss = kl_defen_forward(x_feat, x_feat_noise, part_layer)
    loss = jax.block_until_ready(loss)

    # Pure-JAX reference (PyTorch batchmean KLDivLoss semantics).
    def ref_kl(gen, tgt):
        log_p = jax.nn.log_softmax(gen, axis=1)
        q = jax.nn.softmax(tgt, axis=1)
        log_q = jax.nn.log_softmax(tgt, axis=1)
        return jnp.sum(q * (log_q - log_p)) / gen.shape[0]

    pt1 = x_feat[:, 0:1]
    pt1n = x_feat_noise[:, 0:1]
    nf1 = jnp.concatenate([pt1, x_feat_noise[:, 1:]], axis=1)
    nf1n = jnp.concatenate([pt1n, pt1[:, 1:]], axis=1)
    a1 = part_layer(nf1)[:, 0]
    a2 = part_layer(nf1n)[:, 0]
    ref = (ref_kl(a1, x_feat[:, 0]) + ref_kl(a2, x_feat_noise[:, 0])) / 2.0

    assert jnp.allclose(loss, ref, atol=1e-6, rtol=1e-4), (float(loss), float(ref))
    print("KERNEL_OK")
</pallas_src>

<mosaic_0001>
module attributes {stable_mosaic.version = 11 : i64} {
  func.func @_kl_pair_kernel(%arg0: i32, %arg1: memref<8x768xf32, #tpu.memory_space<vmem>>, %arg2: memref<8x768xf32, #tpu.memory_space<vmem>>, %arg3: memref<8x768xf32, #tpu.memory_space<vmem>>, %arg4: memref<8x768xf32, #tpu.memory_space<vmem>>, %arg5: memref<1x1xf32, #tpu.memory_space<vmem>>) attributes {dimension_semantics = [#tpu.dimension_semantics<arbitrary>], iteration_bounds = array<i64: 1>, scalar_prefetch = 0 : i64, scratch_operands = 0 : i64, tpu.core_type = #tpu.core_type<tc>, window_params = [{transform_indices = @transform_0, window_bounds = array<i64: 8, 768>}, {transform_indices = @transform_1, window_bounds = array<i64: 8, 768>}, {transform_indices = @transform_2, window_bounds = array<i64: 8, 768>}, {transform_indices = @transform_3, window_bounds = array<i64: 8, 768>}, {pipeline_mode = #tpu.pipeline_mode<synchronous>, transform_indices = @transform_4, window_bounds = array<i64: 1, 1>}]} {
    %c0_i32 = arith.constant 0 : i32
    %0 = arith.cmpi eq, %arg0, %c0_i32 : i32
    %1 = arith.extui %0 : i1 to i32
    %c0_i32_0 = arith.constant 0 : i32
    %2 = arith.cmpi ne, %1, %c0_i32_0 : i32
    scf.if %2 {
      %cst_25 = arith.constant 0.000000e+00 : f32
      %68 = vector.broadcast %cst_25 : f32 to vector<1x1xf32>
      %c0_26 = arith.constant 0 : index
      %c0_27 = arith.constant 0 : index
      %69 = vector.load %arg5[%c0_26, %c0_27] : memref<1x1xf32, #tpu.memory_space<vmem>>, vector<1x1xf32>
      tpu.vector_store %arg5[%c0_26, %c0_27], %68 {strides = array<i32>} : memref<1x1xf32, #tpu.memory_space<vmem>>, vector<1x1xf32>,
    } else {
    }
    %c0 = arith.constant 0 : index
    %c0_1 = arith.constant 0 : index
    %3 = vector.load %arg5[%c0, %c0_1] : memref<1x1xf32, #tpu.memory_space<vmem>>, vector<1x1xf32>
    %c0_2 = arith.constant 0 : index
    %c0_3 = arith.constant 0 : index
    %4 = vector.load %arg1[%c0_2, %c0_3] : memref<8x768xf32, #tpu.memory_space<vmem>>, vector<8x768xf32>
    %c0_4 = arith.constant 0 : index
    %c0_5 = arith.constant 0 : index
    %5 = vector.load %arg2[%c0_4, %c0_5] : memref<8x768xf32, #tpu.memory_space<vmem>>, vector<8x768xf32>
    %cst = arith.constant dense<0xFF800000> : vector<8xf32>
    %6 = vector.multi_reduction <maximumf>, %4, %cst [1] : vector<8x768xf32> to vector<8xf32>
    %7 = vector.shape_cast %6 : vector<8xf32> to vector<8x1xf32>
    %8 = vector.broadcast %7 : vector<8x1xf32> to vector<8x768xf32>
    %9 = arith.subf %4, %8 : vector<8x768xf32>
    %cst_6 = arith.constant dense<0xFF800000> : vector<8xf32>
    %10 = vector.multi_reduction <maximumf>, %5, %cst_6 [1] : vector<8x768xf32> to vector<8xf32>
    %11 = vector.shape_cast %10 : vector<8xf32> to vector<8x1xf32>
    %12 = vector.broadcast %11 : vector<8x1xf32> to vector<8x768xf32>
    %13 = arith.subf %5, %12 : vector<8x768xf32>
    %14 = math.exp %9 : vector<8x768xf32>
    %cst_7 = arith.constant dense<0.000000e+00> : vector<8xf32>
    %15 = vector.multi_reduction <add>, %14, %cst_7 [1] : vector<8x768xf32> to vector<8xf32>
    %16 = vector.shape_cast %15 : vector<8xf32> to vector<8x1xf32>
    %17 = math.log %16 : vector<8x1xf32>
    %18 = math.exp %13 : vector<8x768xf32>
    %cst_8 = arith.constant dense<0.000000e+00> : vector<8xf32>
    %19 = vector.multi_reduction <add>, %18, %cst_8 [1] : vector<8x768xf32> to vector<8xf32>
    %20 = vector.shape_cast %19 : vector<8xf32> to vector<8x1xf32>
    %21 = math.log %20 : vector<8x1xf32>
    %22 = vector.broadcast %17 : vector<8x1xf32> to vector<8x768xf32>
    %23 = arith.subf %9, %22 : vector<8x768xf32>
    %24 = vector.broadcast %21 : vector<8x1xf32> to vector<8x768xf32>
    %25 = arith.subf %13, %24 : vector<8x768xf32>
    %26 = math.exp %25 : vector<8x768xf32>
    %27 = arith.subf %25, %23 : vector<8x768xf32>
    %28 = arith.mulf %26, %27 : vector<8x768xf32>
    %cst_9 = arith.constant dense<0.000000e+00> : vector<8xf32>
    %29 = vector.multi_reduction <add>, %28, %cst_9 [1] : vector<8x768xf32> to vector<8xf32>
    %30 = vector.shape_cast %29 : vector<8xf32> to vector<8x1xf32>
    %cst_10 = arith.constant dense<0.000000e+00> : vector<1xf32>
    %31 = vector.multi_reduction <add>, %30, %cst_10 [0] : vector<8x1xf32> to vector<1xf32>
    %32 = vector.shape_cast %31 : vector<1xf32> to vector<1x1xf32>
    %33 = arith.addf %3, %32 : vector<1x1xf32>
    %c0_11 = arith.constant 0 : index
    %c0_12 = arith.constant 0 : index
    %34 = vector.load %arg3[%c0_11, %c0_12] : memref<8x768xf32, #tpu.memory_space<vmem>>, vector<8x768xf32>
    %c0_13 = arith.constant 0 : index
    %c0_14 = arith.constant 0 : index
    %35 = vector.load %arg4[%c0_13, %c0_14] : memref<8x768xf32, #tpu.memory_space<vmem>>, vector<8x768xf32>
    %cst_15 = arith.constant dense<0xFF800000> : vector<8xf32>
    %36 = vector.multi_reduction <maximumf>, %34, %cst_15 [1] : vector<8x768xf32> to vector<8xf32>
    %37 = vector.shape_cast %36 : vector<8xf32> to vector<8x1xf32>
    %38 = vector.broadcast %37 : vector<8x1xf32> to vector<8x768xf32>
    %39 = arith.subf %34, %38 : vector<8x768xf32>
    %cst_16 = arith.constant dense<0xFF800000> : vector<8xf32>
    %40 = vector.multi_reduction <maximumf>, %35, %cst_16 [1] : vector<8x768xf32> to vector<8xf32>
    %41 = vector.shape_cast %40 : vector<8xf32> to vector<8x1xf32>
    %42 = vector.broadcast %41 : vector<8x1xf32> to vector<8x768xf32>
    %43 = arith.subf %35, %42 : vector<8x768xf32>
    %44 = math.exp %39 : vector<8x768xf32>
    %cst_17 = arith.constant dense<0.000000e+00> : vector<8xf32>
    %45 = vector.multi_reduction <add>, %44, %cst_17 [1] : vector<8x768xf32> to vector<8xf32>
    %46 = vector.shape_cast %45 : vector<8xf32> to vector<8x1xf32>
    %47 = math.log %46 : vector<8x1xf32>
    %48 = math.exp %43 : vector<8x768xf32>
    %cst_18 = arith.constant dense<0.000000e+00> : vector<8xf32>
    %49 = vector.multi_reduction <add>, %48, %cst_18 [1] : vector<8x768xf32> to vector<8xf32>
    %50 = vector.shape_cast %49 : vector<8xf32> to vector<8x1xf32>
    %51 = math.log %50 : vector<8x1xf32>
    %52 = vector.broadcast %47 : vector<8x1xf32> to vector<8x768xf32>
    %53 = arith.subf %39, %52 : vector<8x768xf32>
    %54 = vector.broadcast %51 : vector<8x1xf32> to vector<8x768xf32>
    %55 = arith.subf %43, %54 : vector<8x768xf32>
    %56 = math.exp %55 : vector<8x768xf32>
    %57 = arith.subf %55, %53 : vector<8x768xf32>
    %58 = arith.mulf %56, %57 : vector<8x768xf32>
    %cst_19 = arith.constant dense<0.000000e+00> : vector<8xf32>
    %59 = vector.multi_reduction <add>, %58, %cst_19 [1] : vector<8x768xf32> to vector<8xf32>
    %60 = vector.shape_cast %59 : vector<8xf32> to vector<8x1xf32>
    %cst_20 = arith.constant dense<0.000000e+00> : vector<1xf32>
    %61 = vector.multi_reduction <add>, %60, %cst_20 [0] : vector<8x1xf32> to vector<1xf32>
    %62 = vector.shape_cast %61 : vector<1xf32> to vector<1x1xf32>
    %63 = arith.addf %33, %62 : vector<1x1xf32>
    %c0_21 = arith.constant 0 : index
    %c0_22 = arith.constant 0 : index
    %64 = vector.load %arg5[%c0_21, %c0_22] : memref<1x1xf32, #tpu.memory_space<vmem>>, vector<1x1xf32>
    tpu.vector_store %arg5[%c0_21, %c0_22], %63 {strides = array<i32>} : memref<1x1xf32, #tpu.memory_space<vmem>>, vector<1x1xf32>,
    %c0_i32_23 = arith.constant 0 : i32
    %65 = arith.cmpi eq, %arg0, %c0_i32_23 : i32
    %66 = arith.extui %65 : i1 to i32
    %c0_i32_24 = arith.constant 0 : i32
    %67 = arith.cmpi ne, %66, %c0_i32_24 : i32
    scf.if %67 {
      %c0_25 = arith.constant 0 : index
      %c0_26 = arith.constant 0 : index
      %68 = vector.load %arg5[%c0_25, %c0_26] : memref<1x1xf32, #tpu.memory_space<vmem>>, vector<1x1xf32>
      %cst_27 = arith.constant 2.500000e-01 : f32
      %69 = vector.broadcast %cst_27 : f32 to vector<1x1xf32>
      %70 = arith.mulf %68, %69 : vector<1x1xf32>
      %c0_28 = arith.constant 0 : index
      %c0_29 = arith.constant 0 : index
      %71 = vector.load %arg5[%c0_28, %c0_29] : memref<1x1xf32, #tpu.memory_space<vmem>>, vector<1x1xf32>
      tpu.vector_store %arg5[%c0_28, %c0_29], %70 {strides = array<i32>} : memref<1x1xf32, #tpu.memory_space<vmem>>, vector<1x1xf32>,
    } else {
    }
    return
  }
  func.func @transform_0(%arg0: i32) -> (i32, i32) {
    %c0_i32 = arith.constant 0 : i32
    %c0_i32_0 = arith.constant 0 : i32
    return %arg0, %c0_i32 : i32, i32
  }
  func.func @transform_1(%arg0: i32) -> (i32, i32) {
    %c0_i32 = arith.constant 0 : i32
    %c0_i32_0 = arith.constant 0 : i32
    return %arg0, %c0_i32 : i32, i32
  }
  func.func @transform_2(%arg0: i32) -> (i32, i32) {
    %c0_i32 = arith.constant 0 : i32
    %c0_i32_0 = arith.constant 0 : i32
    return %arg0, %c0_i32 : i32, i32
  }
  func.func @transform_3(%arg0: i32) -> (i32, i32) {
    %c0_i32 = arith.constant 0 : i32
    %c0_i32_0 = arith.constant 0 : i32
    return %arg0, %c0_i32 : i32, i32
  }
  func.func @transform_4(%arg0: i32) -> (i32, i32) {
    %c0_i32 = arith.constant 0 : i32
    %c0_i32_0 = arith.constant 0 : i32
    %c0_i32_1 = arith.constant 0 : i32
    return %c0_i32, %c0_i32_0 : i32, i32
  }
}

</mosaic_0001>

<bundles_post_ra>
// kernel: tpu_custom_call.1
= control target key start
LH: loop header
LB: loop body
LE: loop exit
PB: predicated region body
PF: predicated region fallthrough
CT: control target
= control target key end

     0   :  { %9 = vsyncpa [#allocation3], 0  ;;  %s748_s0 = inlined_call_operand.hbm [shape: f32[8,768], index: 0, kind: input, shape index: {}]   ;;  %s749_s1 = inlined_call_operand.hbm [shape: f32[8,768], index: 1, kind: input, shape index: {}]   ;;  %s750_s2 = inlined_call_operand.hbm [shape: f32[8,768], index: 2, kind: input, shape index: {}]   ;;  %s751_s3 = inlined_call_operand.hbm [shape: f32[8,768], index: 3, kind: input, shape index: {}]   ;;  %s752_s4 = inlined_call_operand.hbm [shape: f32[1,1], index: 4, kind: output, shape index: {}]  }
   0x1   :  { %10 = vsyncpa [#allocation6], 0 }
   0x2   :  { %11 = vsyncpa [#allocation9], 0 }
   0x3   :  { %12 = vsyncpa [#allocation4], 0  ;;  %s551_s15 = smov [#allocation5]   ;;  %s552_s17 = smov [#allocation2]  }
   0x4   :  { %s29_s16 = sshll.u32 %s551_s15, 4  ;;  %s19_s18 = sshll.u32 %s552_s17, 4  ;;  %s30_s16 = int_to_ptr.vmem [resolvable:$true] %s29_s16  ;;  %s20_s18 = int_to_ptr.vmem [resolvable:$true] %s19_s18 }
   0x5   :  { %s451_s19 = scalar_lea.vmem %s30_s16, 768  ;;  %p456_p1 = scmp.lt.s32.totalorder %s30_s16, %s30_s16 }
   0x6   :  { %p452_p0 = scmp.ne.s32.totalorder %s30_s16, %s451_s19  ;;  %p457_p2 = scmp.lt.s32.totalorder %s451_s19, %s451_s19 }
   0x8   :  { %p458_p3 = por %p457_p2, %p456_p1 }
   0xa   :  { %p459_p4 = pnand %p458_p3, %p452_p0 }
   0xc   :  { %462 = shalt.err (!%p459_p4)
}
   0xd   :  { %32 = dma.hbm_to_vmem [thread:$0]  %s749_s1, 768, %s30_s16, [#allocation6]  }
   0xe   :  { %s471_s22 = scalar_lea.vmem %s20_s18, 768  ;;  %p476_p6 = scmp.lt.s32.totalorder %s20_s18, %s20_s18 }
   0xf   :  { %p472_p5 = scmp.ne.s32.totalorder %s20_s18, %s471_s22  ;;  %p477_p7 = scmp.lt.s32.totalorder %s471_s22, %s471_s22 }
  0x11   :  { %p478_p8 = por %p477_p7, %p476_p6 }
  0x13   :  { %p479_p9 = pnand %p478_p8, %p472_p5 }
  0x15   :  { %482 = shalt.err (!%p479_p9)
}
  0x16   :  { %22 = dma.hbm_to_vmem [thread:$0]  %s748_s0, 768, %s20_s18, [#allocation3]  }
  0x17   :  { %s553_s25 = smov [#allocation7]   ;;  %s554_s27 = smov [#allocation8]  }
  0x18   :  { %s39_s26 = sshll.u32 %s553_s25, 4  ;;  %s49_s28 = sshll.u32 %s554_s27, 4  ;;  %s40_s26 = int_to_ptr.vmem [resolvable:$true] %s39_s26  ;;  %s50_s28 = int_to_ptr.vmem [resolvable:$true] %s49_s28 }
  0x19   :  { %s491_s29 = scalar_lea.vmem %s40_s26, 768  ;;  %p496_p11 = scmp.lt.s32.totalorder %s40_s26, %s40_s26 }
  0x1a   :  { %p492_p10 = scmp.ne.s32.totalorder %s40_s26, %s491_s29  ;;  %p497_p12 = scmp.lt.s32.totalorder %s491_s29, %s491_s29 }
  0x1c   :  { %p498_p13 = por %p497_p12, %p496_p11 }
  0x1e   :  { %p499_p0 = pnand %p498_p13, %p492_p10 }
  0x20   :  { %502 = shalt.err (!%p499_p0)
}
  0x21   :  { %42 = dma.hbm_to_vmem [thread:$0]  %s750_s2, 768, %s40_s26, [#allocation6]  }
  0x22   :  { %s511_s5 = scalar_lea.vmem %s50_s28, 768  ;;  %p516_p2 = scmp.lt.s32.totalorder %s50_s28, %s50_s28 }
  0x23   :  { %p512_p1 = scmp.ne.s32.totalorder %s50_s28, %s511_s5  ;;  %p517_p3 = scmp.lt.s32.totalorder %s511_s5, %s511_s5 }
  0x25   :  { %p518_p4 = por %p517_p3, %p516_p2 }
  0x27   :  { %p519_p5 = pnand %p518_p4, %p512_p1 }
  0x29   :  { %522 = shalt.err (!%p519_p5)
}
  0x2a   :  { %52 = dma.hbm_to_vmem [thread:$0]  %s751_s3, 768, %s50_s28, [#allocation9]  }
  0x2b   :  { %543 = dma.done.wait [#allocation3], 768  }
  0x2c   :  { %544 = vsyncadd [#allocation3], 4294966528 }
  0x2d   :  { %545 = dma.done.wait [#allocation6], 1536  }
  0x2e   :  { %546 = vsyncadd [#allocation6], 4294965760 }
  0x2f   :  { %547 = dma.done.wait [#allocation9], 768  }
  0x30   :  { %548 = vsyncadd [#allocation9], 4294966528  ;;  %v78_v0 = vld [vmem:[#allocation5] sm:$0xff]  ;;  %v79_v1 = vld [vmem:[#allocation5 + $0x8] sm:$0xff]  ;;  %vm69_vm0 = vcmask 0   ;;  %s556_s2 = smov [#allocation10]  }
  0x31   :  { %v80_v2 = vld [vmem:[#allocation5 + $0x10] sm:$0xff]  ;;  %v81_v3 = vld [vmem:[#allocation5 + $0x18] sm:$0xff]  ;;  %v82_v4 = vld [vmem:[#allocation5 + $0x20] sm:$0xff]  ;;  %s346_s3 = sshll.u32 %s556_s2, 4  ;;  %s347_s3 = int_to_ptr.vmem [resolvable:$true] %s346_s3 }
  0x32   :  { %v83_v5 = vld [vmem:[#allocation5 + $0x28] sm:$0xff]  ;;  %v97_v6 = vmax.f32 %v78_v0, %v82_v4  ;;  %v100_v8 = vmax.f32 %v80_v2, %v81_v3  ;;  %v208_v9 = vld [vmem:[#allocation8] sm:$0xff]  ;;  %v210_v11 = vld [vmem:[#allocation8 + $0x10] sm:$0xff]  ;;  %s523_s7 = scalar_lea.vmem %s347_s3, 16  ;;  %s527_s8 = scalar_lea.vmem %s347_s3, 32 }
  0x33   :  { %v98_v7 = vmax.f32 %v79_v1, %v83_v5  ;;  %v209_v10 = vld [vmem:[#allocation8 + $0x8] sm:$0xff]  ;;  %v211_v12 = vld [vmem:[#allocation8 + $0x18] sm:$0xff]  ;;  %v212_v13 = vld [vmem:[#allocation8 + $0x20] sm:$0xff]  ;;  %p524_p6 = scmp.ne.s32.totalorder %s347_s3, %s523_s7  ;;  %p528_p7 = scmp.lt.s32.totalorder %s347_s3, %s347_s3 }
  0x34   :  { %v213_v14 = vld [vmem:[#allocation8 + $0x28] sm:$0xff]  ;;  %v227_v16 = vmax.f32 %v208_v9, %v212_v13  ;;  %v230_v18 = vmax.f32 %v210_v11, %v211_v12  ;;  %v72_v19 = vld [vmem:[#allocation2] sm:$0xff]  ;;  %v73_v20 = vld [vmem:[#allocation2 + $0x8] sm:$0xff]  ;;  %p529_p8 = scmp.lt.s32.totalorder %s527_s8, %s523_s7 }
  0x35   :  { %v99_v15 = vmax.f32 %v97_v6, %v98_v7  ;;  %v228_v17 = vmax.f32 %v209_v10, %v213_v14  ;;  %v74_v21 = vld [vmem:[#allocation2 + $0x10] sm:$0xff]  ;;  %v594_v22 = vld [vmem:[#allocation2 + $0x18] sm:$0xff]  ;;  %v596_v23 = vld [vmem:[#allocation2 + $0x20] sm:$0xff] }
  0x36   :  { %v598_v24 = vld [vmem:[#allocation2 + $0x28] sm:$0xff]  ;;  %v84_v27 = vmax.f32 %v72_v19, %v596_v23  ;;  %v602_v29 = vld [vmem:[#allocation7] sm:$0xff]  ;;  %v606_v31 = vld [vmem:[#allocation7 + $0x10] sm:$0xff]  ;;  %v87_v32 = vmax.f32 %v74_v21, %v594_v22  ;;  %p530_p9 = por %p529_p8, %p528_p7 }
  0x37   :  { %v101_v25 = vmax.f32 %v99_v15, %v100_v8  ;;  %v229_v26 = vmax.f32 %v227_v16, %v228_v17  ;;  %v85_v28 = vmax.f32 %v73_v20, %v598_v24  ;;  %v604_v30 = vld [vmem:[#allocation7 + $0x8] sm:$0xff]  ;;  %v609_v33 = vld [vmem:[#allocation7 + $0x18] sm:$0xff]  ;;  %v611_v34 = vld [vmem:[#allocation7 + $0x20] sm:$0xff] }
  0x38   :  { %v613_v35 = vld [vmem:[#allocation7 + $0x28] sm:$0xff]  ;;  %v214_v38 = vmax.f32 %v602_v29, %v611_v34  ;;  %v217_v40 = vmax.f32 %v606_v31, %v609_v33  ;;  %p531_p10 = pnand %p530_p9, %p524_p6 }
  0x39   :  { %102 = vmax.xlane.f32.xlu0 %v101_v25  ;;  %v231_v36 = vmax.f32 %v229_v26, %v230_v18  ;;  %v86_v37 = vmax.f32 %v84_v27, %v85_v28  ;;  %v215_v39 = vmax.f32 %v604_v30, %v613_v35 }
  0x3b   :  { %v88_v41 = vmax.f32 %v86_v37, %v87_v32  ;;  %v216_v42 = vmax.f32 %v214_v38, %v215_v39 }
  0x3d   :  { %232 = vmax.xlane.f32.xlu0 %v231_v36  ;;  %89 = vmax.xlane.f32.xlu1 %v88_v41  ;;  %v218_v43 = vmax.f32 %v216_v42, %v217_v40 }
  0x41   :  { %219 = vmax.xlane.f32.xlu1 %v218_v43 }
  0xc2   :  { %v103_v44 = vpop.xlane.xlu0 %102 }
  0xc3   :  { %v621_v45 = vsub.f32 %v78_v0, %v103_v44  ;;  %v623_v46 = vsub.f32 %v79_v1, %v103_v44  ;;  %v625_v47 = vsub.f32 %v80_v2, %v103_v44  ;;  %v627_v48 = vsub.f32 %v81_v3, %v103_v44 }
  0xc4   :  { %v629_v49 = vsub.f32 %v82_v4, %v103_v44  ;;  %v631_v50 = vsub.f32 %v83_v5, %v103_v44 }
  0xc5   :  { %v131_v51 = vmul.f32 1.442695, %v621_v45  ;;  %v133_v52 = vmul.f32 1.442695, %v623_v46  ;;  %v135_v53 = vmul.f32 1.442695, %v625_v47 }
  0xc6   :  { %v137_v54 = vmul.f32 1.442695, %v627_v48  ;;  %v139_v55 = vmul.f32 1.442695, %v629_v49  ;;  %v233_v56 = vpop.xlane.xlu0 %232  ;;  %v141_v60 = vmul.f32 1.442695, %v631_v50  ;;  %v90_v62 = vpop.xlane.xlu1 %89 }
  0xc7   :  { %363 = vpow2.f32 %v131_v51  ;;  %v638_v57 = vsub.f32 %v208_v9, %v233_v56  ;;  %v640_v58 = vsub.f32 %v209_v10, %v233_v56  ;;  %v642_v59 = vsub.f32 %v210_v11, %v233_v56 }
  0xc8   :  { %365 = vpow2.f32 %v133_v52  ;;  %v645_v61 = vsub.f32 %v211_v12, %v233_v56  ;;  %v647_v63 = vsub.f32 %v212_v13, %v233_v56  ;;  %v650_v1 = vsub.f32 %v213_v14, %v233_v56 }
  0xc9   :  { %367 = vpow2.f32 %v135_v53  ;;  %v261_v0 = vmul.f32 1.442695, %v638_v57  ;;  %v263_v2 = vmul.f32 1.442695, %v640_v58  ;;  %v265_v3 = vmul.f32 1.442695, %v642_v59 }
  0xca   :  { %369 = vpow2.f32 %v137_v54  ;;  %v654_v4 = vsub.f32 %v72_v19, %v90_v62  ;;  %v267_v5 = vmul.f32 1.442695, %v645_v61  ;;  %v657_v6 = vsub.f32 %v73_v20, %v90_v62  ;;  %v220_v11 = vpop.xlane.xlu1 %219 }
  0xcb   :  { %371 = vpow2.f32 %v139_v55  ;;  %v269_v7 = vmul.f32 1.442695, %v647_v63  ;;  %v660_v8 = vsub.f32 %v74_v21, %v90_v62  ;;  %v271_v9 = vmul.f32 1.442695, %v650_v1 }
  0xcc   :  { %373 = vpow2.f32 %v141_v60  ;;  %v664_v10 = vsub.f32 %v594_v22, %v90_v62  ;;  %v667_v12 = vsub.f32 %v596_v23, %v90_v62  ;;  %v110_v13 = vmul.f32 1.442695, %v654_v4 }
  0xcd   :  { %375 = vpow2.f32 %v261_v0  ;;  %v671_v14 = vsub.f32 %v598_v24, %v90_v62  ;;  %v112_v15 = vmul.f32 1.442695, %v657_v6  ;;  %v114_v16 = vmul.f32 1.442695, %v660_v8 }
  0xce   :  { %377 = vpow2.f32 %v263_v2  ;;  %v676_v17 = vsub.f32 %v602_v29, %v220_v11  ;;  %v116_v18 = vmul.f32 1.442695, %v664_v10  ;;  %v680_v19 = vsub.f32 %v604_v30, %v220_v11 }
  0xcf   :  { %379 = vpow2.f32 %v265_v3  ;;  %v118_v20 = vmul.f32 1.442695, %v667_v12  ;;  %v684_v21 = vsub.f32 %v606_v31, %v220_v11  ;;  %v120_v23 = vmul.f32 1.442695, %v671_v14 }
  0xd0   :  { %381 = vpow2.f32 %v267_v5  ;;  %v688_v24 = vsub.f32 %v609_v33, %v220_v11  ;;  %v240_v26 = vmul.f32 1.442695, %v676_v17  ;;  %v692_v28 = vsub.f32 %v611_v34, %v220_v11 }
  0xd1   :  { %383 = vpow2.f32 %v269_v7  ;;  %v242_v29 = vmul.f32 1.442695, %v680_v19  ;;  %v244_v32 = vmul.f32 1.442695, %v684_v21  ;;  %v697_v33 = vsub.f32 %v613_v35, %v220_v11 }
  0xd2   :  { %385 = vpow2.f32 %v271_v9  ;;  %v246_v37 = vmul.f32 1.442695, %v688_v24  ;;  %v248_v34 = vmul.f32 1.442695, %v692_v28 }
  0xd3   :  { %387 = vpow2.f32 %v110_v13  ;;  %v250_v44 = vmul.f32 1.442695, %v697_v33 }
  0xd4   :  { %v364_v22 = vpop.eup %363  ;;  %389 = vpow2.f32 %v112_v15 }
  0xd5   :  { %v366_v25 = vpop.eup %365  ;;  %391 = vpow2.f32 %v114_v16 }
  0xd6   :  { %v368_v27 = vpop.eup %367  ;;  %393 = vpow2.f32 %v116_v18  ;;  %v143_v30 = vadd.f32 %v366_v25, %v364_v22 }
  0xd7   :  { %v370_v31 = vpop.eup %369  ;;  %395 = vpow2.f32 %v118_v20 }
  0xd8   :  { %v372_v36 = vpop.eup %371  ;;  %397 = vpow2.f32 %v120_v23  ;;  %v144_v38 = vadd.f32 %v368_v27, %v143_v30 }
  0xd9   :  { %v374_v39 = vpop.eup %373  ;;  %399 = vpow2.f32 %v240_v26 }
  0xda   :  { %v376_v40 = vpop.eup %375  ;;  %401 = vpow2.f32 %v242_v29  ;;  %v145_v41 = vadd.f32 %v370_v31, %v144_v38  ;;  %v555_v38 = vmov 0.0  }
  0xdb   :  { %v378_v42 = vpop.eup %377  ;;  %403 = vpow2.f32 %v244_v32  ;;  %70 = vst.msk [vmem:[#allocation10] sm:$0x1] %vm69_vm0, %v555_v38 }
  0xdc   :  { %v380_v43 = vpop.eup %379  ;;  %405 = vpow2.f32 %v246_v37  ;;  %v146_v51 = vadd.f32 %v372_v36, %v145_v41  ;;  %v273_v52 = vadd.f32 %v378_v42, %v376_v40 }
  0xdd   :  { %v382_v35 = vpop.eup %381  ;;  %407 = vpow2.f32 %v248_v34 }
  0xde   :  { %v384_v53 = vpop.eup %383  ;;  %v147_v54 = vadd.f32 %v374_v39, %v146_v51  ;;  %v274_v55 = vadd.f32 %v380_v43, %v273_v52  ;;  %409 = vpow2.f32 %v250_v44 }
  0xdf   :  { %v386_v56 = vpop.eup %385 }
  0xe0   :  { %v388_v60 = vpop.eup %387  ;;  %148 = vadd.xlane.f32.xlu0 %v147_v54  ;;  %v275_v62 = vadd.f32 %v382_v35, %v274_v55 }
  0xe1   :  { %v390_v0 = vpop.eup %389 }
  0xe2   :  { %v392_v2 = vpop.eup %391  ;;  %v276_v3 = vadd.f32 %v384_v53, %v275_v62  ;;  %v122_v5 = vadd.f32 %v390_v0, %v388_v60 }
  0xe3   :  { %v394_v7 = vpop.eup %393 }
  0xe4   :  { %v396_v9 = vpop.eup %395  ;;  %v277_v11 = vadd.f32 %v386_v56, %v276_v3  ;;  %v123_v13 = vadd.f32 %v392_v2, %v122_v5 }
  0xe5   :  { %v398_v15 = vpop.eup %397 }
  0xe6   :  { %v400_v16 = vpop.eup %399  ;;  %278 = vadd.xlane.f32.xlu1 %v277_v11  ;;  %v124_v18 = vadd.f32 %v394_v7, %v123_v13 }
  0xe7   :  { %v402_v20 = vpop.eup %401 }
  0xe8   :  { %v404_v22 = vpop.eup %403  ;;  %v125_v23 = vadd.f32 %v396_v9, %v124_v18  ;;  %v252_v25 = vadd.f32 %v402_v20, %v400_v16 }
  0xe9   :  { %v406_v26 = vpop.eup %405 }
  0xea   :  { %v126_v27 = vadd.f32 %v398_v15, %v125_v23  ;;  %v253_v29 = vadd.f32 %v404_v22, %v252_v25  ;;  %v408_v30 = vpop.eup %407 }
  0xeb   :  { %v410_v32 = vpop.eup %409 }
  0xec   :  { %127 = vadd.xlane.f32.xlu0 %v126_v27  ;;  %v254_v31 = vadd.f32 %v406_v26, %v253_v29 }
  0xee   :  { %v255_v36 = vadd.f32 %v408_v30, %v254_v31 }
  0xf0   :  { %v256_v37 = vadd.f32 %v410_v32, %v255_v36 }
  0xf2   :  { %257 = vadd.xlane.f32.xlu1 %v256_v37 }
 0x169   :  { %v149_v39 = vpop.xlane.xlu0 %148 }
 0x16a   :  { %411 = vlog2.f32 %v149_v39 }
 0x16f   :  { %v279_v40 = vpop.xlane.xlu1 %278 }
 0x170   :  { %413 = vlog2.f32 %v279_v40 }
 0x175   :  { %v128_v34 = vpop.xlane.xlu0 %127 }
 0x176   :  { %415 = vlog2.f32 %v128_v34 }
 0x177   :  { %v412_v41 = vpop.eup %411 }
 0x178   :  { %v151_v42 = vmul.f32 0.6931472, %v412_v41 }
 0x17a   :  { %v158_v43 = vsub.f32 %v621_v45, %v151_v42  ;;  %v159_v44 = vsub.f32 %v623_v46, %v151_v42  ;;  %v160_v51 = vsub.f32 %v625_v47, %v151_v42  ;;  %v161_v52 = vsub.f32 %v627_v48, %v151_v42 }
 0x17b   :  { %v258_v35 = vpop.xlane.xlu1 %257  ;;  %v708_v53 = vsub.f32 %v629_v49, %v151_v42  ;;  %v711_v54 = vsub.f32 %v631_v50, %v151_v42 }
 0x17c   :  { %417 = vlog2.f32 %v258_v35  ;;  %v164_v55 = vmul.f32 1.442695, %v158_v43  ;;  %v166_v56 = vmul.f32 1.442695, %v159_v44  ;;  %v168_v60 = vmul.f32 1.442695, %v160_v51 }
 0x17d   :  { %v414_v62 = vpop.eup %413  ;;  %v170_v0 = vmul.f32 1.442695, %v161_v52  ;;  %v172_v46 = vmul.f32 1.442695, %v708_v53  ;;  %v174_v47 = vmul.f32 1.442695, %v711_v54 }
 0x17e   :  { %v281_v45 = vmul.f32 0.6931472, %v414_v62  ;;  %419 = vpow2.f32 %v164_v55 }
 0x17f   :  { %421 = vpow2.f32 %v166_v56 }
 0x180   :  { %423 = vpow2.f32 %v168_v60  ;;  %v288_v48 = vsub.f32 %v638_v57, %v281_v45  ;;  %v289_v49 = vsub.f32 %v640_v58, %v281_v45  ;;  %v290_v50 = vsub.f32 %v642_v59, %v281_v45 }
 0x181   :  { %425 = vpow2.f32 %v170_v0  ;;  %v291_v2 = vsub.f32 %v645_v61, %v281_v45  ;;  %v720_v3 = vsub.f32 %v647_v63, %v281_v45  ;;  %v723_v11 = vsub.f32 %v650_v1, %v281_v45 }
 0x182   :  { %427 = vpow2.f32 %v172_v46  ;;  %v294_v5 = vmul.f32 1.442695, %v288_v48  ;;  %v296_v7 = vmul.f32 1.442695, %v289_v49  ;;  %v298_v13 = vmul.f32 1.442695, %v290_v50 }
 0x183   :  { %v416_v9 = vpop.eup %415  ;;  %429 = vpow2.f32 %v174_v47  ;;  %v300_v58 = vmul.f32 1.442695, %v291_v2  ;;  %v302_v61 = vmul.f32 1.442695, %v720_v3  ;;  %v304_v63 = vmul.f32 1.442695, %v723_v11 }
 0x184   :  { %v130_v57 = vmul.f32 0.6931472, %v416_v9  ;;  %431 = vpow2.f32 %v294_v5 }
 0x185   :  { %433 = vpow2.f32 %v296_v7 }
 0x186   :  { %v152_v59 = vsub.f32 %v654_v4, %v130_v57  ;;  %v153_v15 = vsub.f32 %v657_v6, %v130_v57  ;;  %435 = vpow2.f32 %v298_v13  ;;  %v154_v18 = vsub.f32 %v660_v8, %v130_v57 }
 0x187   :  { %437 = vpow2.f32 %v300_v58  ;;  %v155_v23 = vsub.f32 %v664_v10, %v130_v57  ;;  %v156_v29 = vsub.f32 %v667_v12, %v130_v57  ;;  %v157_v36 = vsub.f32 %v671_v14, %v130_v57 }
 0x188   :  { %v176_v20 = vsub.f32 %v158_v43, %v152_v59  ;;  %439 = vpow2.f32 %v302_v61  ;;  %v177_v25 = vsub.f32 %v159_v44, %v153_v15  ;;  %v178_v30 = vsub.f32 %v160_v51, %v154_v18 }
 0x189   :  { %v418_v16 = vpop.eup %417  ;;  %441 = vpow2.f32 %v304_v63  ;;  %v179_v38 = vsub.f32 %v161_v52, %v155_v23  ;;  %v180_v12 = vsub.f32 %v708_v53, %v156_v29  ;;  %v181_v35 = vsub.f32 %v711_v54, %v157_v36 }
 0x18a   :  { %v260_v1 = vmul.f32 0.6931472, %v418_v16 }
 0x18b   :  { %v420_v22 = vpop.eup %419 }
 0x18c   :  { %v422_v4 = vpop.eup %421  ;;  %v182_v26 = vmul.f32 %v420_v22, %v176_v20  ;;  %v282_v27 = vsub.f32 %v676_v17, %v260_v1  ;;  %v283_v8 = vsub.f32 %v680_v19, %v260_v1  ;;  %v284_v40 = vsub.f32 %v684_v21, %v260_v1 }
 0x18d   :  { %v424_v6 = vpop.eup %423  ;;  %v183_v31 = vmul.f32 %v422_v4, %v177_v25  ;;  %v285_v41 = vsub.f32 %v688_v24, %v260_v1  ;;  %v286_v14 = vsub.f32 %v692_v28, %v260_v1  ;;  %v287_v24 = vsub.f32 %v697_v33, %v260_v1  ;;  %v71_v4 = vld [vmem:[#allocation10] sm:$0x1] }
 0x18e   :  { %v426_v32 = vpop.eup %425  ;;  %v184_v39 = vmul.f32 %v424_v6, %v178_v30  ;;  %v306_v17 = vsub.f32 %v288_v48, %v282_v27  ;;  %v307_v51 = vsub.f32 %v289_v49, %v283_v8  ;;  %v308_v60 = vsub.f32 %v290_v50, %v284_v40 }
 0x18f   :  { %v428_v37 = vpop.eup %427  ;;  %v188_v10 = vadd.f32 %v183_v31, %v182_v26  ;;  %v185_v43 = vmul.f32 %v426_v32, %v179_v38  ;;  %v309_v0 = vsub.f32 %v291_v2, %v285_v41  ;;  %v310_v54 = vsub.f32 %v720_v3, %v286_v14 }
 0x190   :  { %v430_v34 = vpop.eup %429  ;;  %v186_v55 = vmul.f32 %v428_v37, %v180_v12  ;;  %v311_v50 = vsub.f32 %v723_v11, %v287_v24 }
 0x191   :  { %v432_v42 = vpop.eup %431  ;;  %v189_v44 = vadd.f32 %v188_v10, %v184_v39  ;;  %v187_v45 = vmul.f32 %v430_v34, %v181_v35 }
 0x192   :  { %v434_v19 = vpop.eup %433  ;;  %v312_v52 = vmul.f32 %v432_v42, %v306_v17 }
 0x193   :  { %v190_v56 = vadd.f32 %v189_v44, %v185_v43  ;;  %v313_v21 = vmul.f32 %v434_v19, %v307_v51  ;;  %v436_v62 = vpop.eup %435 }
 0x194   :  { %v314_v53 = vmul.f32 %v436_v62, %v308_v60  ;;  %v438_v48 = vpop.eup %437 }
 0x195   :  { %v191_v46 = vadd.f32 %v190_v56, %v186_v55  ;;  %v318_v47 = vadd.f32 %v313_v21, %v312_v52  ;;  %v440_v49 = vpop.eup %439  ;;  %v315_v7 = vmul.f32 %v438_v48, %v309_v0 }
 0x196   :  { %v442_v9 = vpop.eup %441  ;;  %v316_v13 = vmul.f32 %v440_v49, %v310_v54 }
 0x197   :  { %v192_v5 = vadd.f32 %v191_v46, %v187_v45  ;;  %v319_v28 = vadd.f32 %v318_v47, %v314_v53  ;;  %v317_v58 = vmul.f32 %v442_v9, %v311_v50 }
 0x199   :  { %193 = vadd.xlane.f32.xlu0 %v192_v5  ;;  %v320_v57 = vadd.f32 %v319_v28, %v315_v7 }
 0x19b   :  { %v321_v33 = vadd.f32 %v320_v57, %v316_v13 }
 0x19d   :  { %v322_v2 = vadd.f32 %v321_v33, %v317_v58 }
 0x19f   :  { %323 = vadd.xlane.f32.xlu1 %v322_v2 }
 0x222   :  { %v194_v59 = vpop.xlane.xlu0 %193 }
 0x223   :  { %v195_v61 = vrot.slane %v194_v59, 4 }
 0x225   :  { %v196_v15 = vadd.f32 %v195_v61, %v194_v59 }
 0x227   :  { %v197_v63 = vrot.slane %v196_v15, 2 }
 0x228   :  { %v324_v16 = vpop.xlane.xlu1 %323 }
 0x229   :  { %v198_v18 = vadd.f32 %v197_v63, %v196_v15  ;;  %v325_v1 = vrot.slane %v324_v16, 4 }
 0x22b   :  { %v199_v3 = vrot.slane %v198_v18, 1  ;;  %v326_v20 = vadd.f32 %v325_v1, %v324_v16 }
 0x22d   :  { %v327_v22 = vrot.slane %v326_v20, 2  ;;  %v200_v23 = vadd.f32 %v199_v3, %v198_v18 }
 0x22f   :  { %v328_v25 = vadd.f32 %v327_v22, %v326_v20  ;;  %v201_v26 = vadd.f32 %v200_v23, %v71_v4 }
 0x231   :  { %v329_v11 = vrot.slane %v328_v25, 1 }
 0x233   :  { %v330_v27 = vadd.f32 %v329_v11, %v328_v25 }
 0x235   :  { %v331_v6 = vadd.f32 %v330_v27, %v201_v26 }
 0x237   :  { %333 = vst.msk [vmem:[#allocation10] sm:$0x1] %vm69_vm0, %v331_v6 }
 0x23e   :  { %v337_v29 = vld [vmem:[#allocation10] sm:$0x1] }
 0x23f   :  { %v338_v30 = vmul.f32 0.25, %v337_v29 }
 0x241   :  { %339 = vst.msk [vmem:[#allocation10] sm:$0x1] %vm69_vm0, %v338_v30 }
 0x242   :  { %534 = shalt.err (!%p531_p10)
}
 0x243   :  { %349 = dma.vmem_to_hbm [thread:$0]  %s347_s3, 16, %s752_s4, [#allocation4]  }
 0x244   :  { %549 = dma.done.wait [#allocation4], 16  }
 0x245   :  { %550 = vsyncadd [#allocation4], 4294967280 }
 0x246   :  { %353 = vsyncpa [#allocation3], 1 }
 0x247   :  { %354 = vsyncpa [#allocation6], 1 }
 0x248   :  { %355 = vsyncpa [#allocation9], 1 }
 0x249   :  { %356 = vsyncpa [#allocation4], 1 }

</bundles_post_ra>
